<compile_context>
chip_gen: v5e
topology: v5e:2x2
jax: 0.10.0
libtpu: 0.0.40
codegen_flags: <defaults>
</compile_context>

<pallas_src>
import functools
import math

import jax
import jax.numpy as jnp
import numpy as np
from jax import lax
from jax.experimental import pallas as pl
from jax.experimental.pallas import tpu as pltpu

GROUPS = 8
GN_EPS = 1e-5


# ---------------------------------------------------------------------------
# Slab layout: (B, C, Nb) where Nb = roundup((H+2)*(W+2), 128); zero border+tail
# ---------------------------------------------------------------------------
def _nb(H, W):
    return (((H + 2) * (W + 2) + 127) // 128) * 128


def to_slab(x, c_pad):
    """(B, C, H, W) -> (B, max(C,c_pad), Nb) zero-padded flat slab."""
    B, C, H, W = x.shape
    Hp, Wp = H + 2, W + 2
    nb = _nb(H, W)
    xp = jnp.pad(x, ((0, 0), (0, 0), (1, 1), (1, 1)))
    flat = xp.reshape(B, C, Hp * Wp)
    return jnp.pad(flat, ((0, 0), (0, max(c_pad - C, 0)), (0, nb - Hp * Wp)))


@functools.lru_cache(maxsize=None)
def _mask_np(H, W):
    """(1, Nb) f32 mask: 1 at valid image lanes, 0 at border/tail."""
    Hp, Wp = H + 2, W + 2
    nb = _nb(H, W)
    m = np.zeros((Hp, Wp), np.float32)
    m[1:H + 1, 1:W + 1] = 1.0
    out = np.zeros((1, nb), np.float32)
    out[0, :Hp * Wp] = m.reshape(-1)
    return out


@functools.lru_cache(maxsize=None)
def _s_down_np(H, W):
    """Stride-2 selection: slab(H,W) position (2oh,2ow) -> slab(H/2,W/2) (oh+1,ow+1)."""
    Wp = W + 2
    nb_in = _nb(H, W)
    H2, W2 = H // 2, W // 2
    Wp2 = W2 + 2
    nb_out = _nb(H2, W2)
    S = np.zeros((nb_in, nb_out), np.float32)
    for oh in range(H2):
        for ow in range(W2):
            S[(2 * oh) * Wp + (2 * ow), (oh + 1) * Wp2 + (ow + 1)] = 1.0
    return S


@functools.lru_cache(maxsize=None)
def _s_up_np(H, W):
    """ConvT phase interleave: phase(ph,pw) value at mid pos (oy,ox) -> out slab (2oy+ph+1, 2ox+pw+1)."""
    Wp = W + 2
    nb_in = _nb(H, W)
    Ho, Wo = 2 * H, 2 * W
    Wpo = Wo + 2
    nb_out = _nb(Ho, Wo)
    S = np.zeros((4 * nb_in, nb_out), np.float32)
    for ph in range(2):
        for pw in range(2):
            phase = 2 * ph + pw
            for oy in range(H):
                for ox in range(W):
                    p = oy * Wp + ox
                    q = (2 * oy + ph + 1) * Wpo + (2 * ox + pw + 1)
                    S[phase * nb_in + p, q] = 1.0
    return S


@functools.lru_cache(maxsize=None)
def _extract_np(H, W):
    """Slab -> dense (H*W) extraction matrix."""
    Wp = W + 2
    nb = _nb(H, W)
    E = np.zeros((nb, H * W), np.float32)
    for i in range(H):
        for j in range(W):
            E[(i + 1) * Wp + (j + 1), i * W + j] = 1.0
    return E


# ---------------------------------------------------------------------------
# Hardware lane-rotate direction probe (makes tap shifts convention-independent)
# ---------------------------------------------------------------------------
def _roll_probe_kernel(x_ref, o_ref):
    o_ref[...] = pltpu.roll(x_ref[...], 1, axis=1)


_ROLL_MATCHES_JNP = None


def _roll_matches_jnp():
    global _ROLL_MATCHES_JNP
    if _ROLL_MATCHES_JNP is None:
        x = jnp.arange(8 * 128, dtype=jnp.float32).reshape(8, 128)
        y = pl.pallas_call(
            _roll_probe_kernel,
            out_shape=jax.ShapeDtypeStruct((8, 128), jnp.float32),
            grid_spec=pltpu.PrefetchScalarGridSpec(
                num_scalar_prefetch=0, grid=(1,),
                in_specs=[pl.BlockSpec((8, 128), lambda i: (0, 0))],
                out_specs=pl.BlockSpec((8, 128), lambda i: (0, 0))),
        )(x)
        y = jax.block_until_ready(y)
        _ROLL_MATCHES_JNP = bool(float(y[0, 1]) == float(x[0, 0]))
    return _ROLL_MATCHES_JNP


def _shift_for(t_off, n):
    """Roll amount so rolled[:, p] == x[:, p + t_off] (static, either hw convention)."""
    if _roll_matches_jnp():
        return (-t_off) % n
    return t_off % n


def shifts_anchor(kh, kw, Wp, n, oh, ow):
    """Tap roll amounts, tap order ki*kw + kj, anchored at (oh, ow)."""
    out = []
    for ki in range(kh):
        for kj in range(kw):
            out.append(_shift_for((ki - oh) * Wp + (kj - ow), n))
    return tuple(out)


# ---------------------------------------------------------------------------
# One-time weight re-layouts (PyTorch layouts -> flat per-conv matrices, bf16)
# ---------------------------------------------------------------------------
def conv_w_flat(w, cin_pad=None):
    """(Cout,Cin,KH,KW) -> (Cout, KH*KW*Cin_pad) bf16; col (ki*KW+kj)*Cin + ci."""
    Cout, Cin, KH, KW = w.shape
    if cin_pad is not None and cin_pad > Cin:
        w = jnp.pad(w, ((0, 0), (0, cin_pad - Cin), (0, 0), (0, 0)))
        Cin = cin_pad
    return jnp.transpose(w, (0, 2, 3, 1)).reshape(Cout, KH * KW * Cin).astype(jnp.bfloat16)


def convT_w_flat(w):
    """ConvTranspose2d(4,2,1) weight (Cin,Cout,4,4) -> (4*Cout, 9*Cin) bf16.

    Row phase*Cout + co (phase = 2*ph+pw), column (r*3+c)*Cin + ci; tap (r,c)
    reads the input at actual offset (r-1, c-1) from the output coarse position."""
    Cin, Cout = w.shape[0], w.shape[1]
    blocks = []
    for ph in range(2):
        for pw in range(2):
            taps = []
            for r in range(3):
                for c in range(3):
                    kh = 3 + ph - 2 * r
                    kw = 3 + pw - 2 * c
                    if 0 <= kh <= 3 and 0 <= kw <= 3:
                        taps.append(jnp.transpose(w[:, :, kh, kw], (1, 0)))  # (Cout, Cin)
                    else:
                        taps.append(jnp.zeros((Cout, Cin), w.dtype))
            blocks.append(jnp.concatenate(taps, axis=1))                     # (Cout, 9*Cin)
    return jnp.concatenate(blocks, axis=0).astype(jnp.bfloat16)              # (4*Cout, 9*Cin)


def pack_res_vec(p, cout):
    """Pack resblock scalars into (Cout, 8): [b1, g1, be1, b2, g2, be2, short_b, 0]."""
    z = jnp.zeros((cout,), jnp.float32)
    cols = [p["conv1_b"], p["norm1_g"], p["norm1_b"],
            p["conv2_b"], p["norm2_g"], p["norm2_b"],
            p.get("short_b", z), z]
    return jnp.stack(cols, axis=1).astype(jnp.float32)


# ---------------------------------------------------------------------------
# In-kernel building blocks (operate on values, not refs)
# ---------------------------------------------------------------------------
def _conv_taps(x, w_flat, bias_col, shifts):
    """Fused tap conv: one K = T*Cin MXU matmul.  x:(Cin,Nb) f32, w:(Cout,T*Cin) bf16."""
    parts = [x if s == 0 else pltpu.roll(x, s, axis=1) for s in shifts]
    stacked = jnp.concatenate(parts, axis=0).astype(jnp.bfloat16)      # (T*Cin, Nb)
    return jnp.dot(w_flat, stacked, preferred_element_type=jnp.float32) + bias_col


def _gn_silu(y, gamma, beta, mask_row, groups, inv_count, eps):
    C, nb = y.shape
    cg = C // groups
    yg = y.reshape(groups, cg, nb)
    m3 = mask_row.reshape(1, 1, nb)
    mean = jnp.sum(yg * m3, axis=(1, 2), keepdims=True) * inv_count
    d = yg - mean
    var = jnp.sum(d * d * m3, axis=(1, 2), keepdims=True) * inv_count
    yn = (d * lax.rsqrt(var + eps)).reshape(C, nb) * gamma + beta
    return yn * jax.nn.sigmoid(yn)                                     # SiLU (f32)


def _resblock(x, w1, w2, vec, temb, short_w, mask_row, shifts, groups, inv_count, eps):
    """conv3x3 -> GN -> SiLU -> (+temb) -> conv3x3 -> GN -> SiLU -> +shortcut; output masked."""
    b1, g1, be1 = vec[:, 0:1], vec[:, 1:2], vec[:, 2:3]
    b2, g2, be2 = vec[:, 3:4], vec[:, 4:5], vec[:, 5:6]
    h = _conv_taps(x, w1, b1, shifts)
    h = _gn_silu(h, g1, be1, mask_row, groups, inv_count, eps)
    if temb is not None:
        h = h + temb
    h = h * mask_row
    h = _conv_taps(h, w2, b2, shifts)
    h = _gn_silu(h, g2, be2, mask_row, groups, inv_count, eps)
    if short_w is not None:
        sc = jnp.dot(short_w, x.astype(jnp.bfloat16),
                     preferred_element_type=jnp.float32) + vec[:, 6:7]
    else:
        sc = x
    return (h + sc) * mask_row


def _attention(x, at_vec, wqkv, bqkv, wo, bo, mask_row, groups, inv_count, eps, scale):
    """GN -> fused QKV -> softmax (invalid key lanes masked) -> proj -> + normalized input."""
    C, L = x.shape
    cg = C // groups
    g, b = at_vec[:, 0:1], at_vec[:, 1:2]
    xg = x.reshape(groups, cg, L)
    m3 = mask_row.reshape(1, 1, L)
    mean = jnp.sum(xg * m3, axis=(1, 2), keepdims=True) * inv_count
    d = xg - mean
    var = jnp.sum(d * d * m3, axis=(1, 2), keepdims=True) * inv_count
    xn = (d * lax.rsqrt(var + eps)).reshape(C, L) * g + b
    xt = xn.T                                                          # (L, C)
    qkv = jnp.dot(xt.astype(jnp.bfloat16), wqkv,
                  preferred_element_type=jnp.float32) + bqkv           # (L, 3C)
    q, k, v = qkv[:, 0:C], qkv[:, C:2 * C], qkv[:, 2 * C:3 * C]
    s = jnp.dot(q.astype(jnp.bfloat16), k.T.astype(jnp.bfloat16),
                preferred_element_type=jnp.float32) * scale            # (L, L)
    s = jnp.where(mask_row > 0.0, s, -1e30)                            # mask invalid keys
    s = s - jnp.max(s, axis=-1, keepdims=True)
    p = jnp.exp(s)
    p = p * pl.reciprocal(jnp.sum(p, axis=-1, keepdims=True), approx=False)
    av = jnp.dot(p.astype(jnp.bfloat16), v.astype(jnp.bfloat16),
                 preferred_element_type=jnp.float32)                   # (L, C)
    out = jnp.dot(av.astype(jnp.bfloat16), wo, preferred_element_type=jnp.float32) + bo
    # NOTE: the PyTorch reference adds the GroupNorm-normalized input as residual.
    return (out + xt).T * mask_row


# ---------------------------------------------------------------------------
# Stage kernels
# ---------------------------------------------------------------------------
def _down_stage_kernel(*refs, first, shifts3, shifts4, groups, inv_count, eps):
    idx = 0
    x_ref = refs[idx]; idx += 1
    if first:
        ci_w, ci_b = refs[idx:idx + 2]; idx += 2
    r1_w1, r1_w2, r1_vec, r1_temb = refs[idx:idx + 4]; idx += 4
    r2_w1, r2_w2, r2_vec = refs[idx:idx + 3]; idx += 3
    dn_w, dn_b, s_dn, mask_ref = refs[idx:idx + 4]; idx += 4
    res_out, mid_out = refs[idx:idx + 2]

    mask = mask_ref[...]
    x = x_ref[0]
    if first:
        x = _conv_taps(x, ci_w[...], ci_b[...], shifts3) * mask
    h = _resblock(x, r1_w1[...], r1_w2[...], r1_vec[...], r1_temb[0], None,
                  mask, shifts3, groups, inv_count, eps)
    h = _resblock(h, r2_w1[...], r2_w2[...], r2_vec[...], None, None,
                  mask, shifts3, groups, inv_count, eps)
    res_out[0] = h                                                     # skip connection
    y = _conv_taps(h, dn_w[...], dn_b[...], shifts4)                   # 4x4 conv at every lane
    # stride-2 subsample + re-slab via 0/1 selection matmul (lane-dense output)
    mid_out[0] = jnp.dot(y.astype(jnp.bfloat16), s_dn[...],
                         preferred_element_type=jnp.float32)


def _mid_stage_kernel(x_ref, r1_w1, r1_w2, r1_vec, at_vec, at_wqkv, at_bqkv,
                      at_wo, at_bo, r2_w1, r2_w2, r2_vec, temb_ref, mask_ref,
                      o_ref, *, shifts3, groups, inv_count, eps, scale, C):
    mask = mask_ref[...]
    temb = temb_ref[0]                                                 # (2C, 1)
    h = _resblock(x_ref[0], r1_w1[...], r1_w2[...], r1_vec[...], temb[0:C, :],
                  None, mask, shifts3, groups, inv_count, eps)
    h = _attention(h, at_vec[...], at_wqkv[...], at_bqkv[...], at_wo[...],
                   at_bo[...], mask, groups, inv_count, eps, scale)
    h = _resblock(h, r2_w1[...], r2_w2[...], r2_vec[...], temb[C:2 * C, :],
                  None, mask, shifts3, groups, inv_count, eps)
    o_ref[0] = h


def _up_stage_kernel(*refs, last, shifts_up, shifts3, groups, inv_count, eps,
                     c_up, nb_mid):
    idx = 0
    x_ref, res_ref, up_w, up_b, s_up = refs[idx:idx + 5]; idx += 5
    r1_w1, r1_w2, r1_vec, r1_sw = refs[idx:idx + 4]; idx += 4
    r2_w1, r2_w2, r2_vec = refs[idx:idx + 3]; idx += 3
    temb_ref = refs[idx]; idx += 1
    if last:
        co_w, co_b, e_mat = refs[idx:idx + 3]; idx += 3
    mask_ref = refs[idx]; idx += 1
    o_ref = refs[idx]

    mask = mask_ref[...]
    temb = temb_ref[0]                                                 # (2*c_up, 1)

    # ConvTranspose2d(4,2,1) as 4-phase effective 3x3 conv + selection interleave.
    yT = _conv_taps(x_ref[0], up_w[...], up_b[...], shifts_up)         # (4*c_up, nb_mid)
    s_all = s_up[...]
    up = None
    for ph in range(4):
        blk = yT[ph * c_up:(ph + 1) * c_up, :].astype(jnp.bfloat16)
        d = jnp.dot(blk, s_all[ph * nb_mid:(ph + 1) * nb_mid, :],
                    preferred_element_type=jnp.float32)
        up = d if up is None else up + d                               # (c_up, nb_out)

    h0 = jnp.concatenate([up, res_ref[0]], axis=0)                     # torch.cat([x, residual], 1)
    h = _resblock(h0, r1_w1[...], r1_w2[...], r1_vec[...], temb[0:c_up, :],
                  r1_sw[...], mask, shifts3, groups, inv_count, eps)
    h = _resblock(h, r2_w1[...], r2_w2[...], r2_vec[...], temb[c_up:2 * c_up, :],
                  None, mask, shifts3, groups, inv_count, eps)
    if last:
        y = _conv_taps(h, co_w[...], co_b[...], shifts3)               # conv_out
        o_ref[0] = jnp.dot(y.astype(jnp.bfloat16), e_mat[...],
                           preferred_element_type=jnp.float32)         # (out_ch, H*W)
    else:
        o_ref[0] = h


# ---------------------------------------------------------------------------
# pallas_call wrappers
# ---------------------------------------------------------------------------
def _full_spec(a):
    shape = tuple(int(s) for s in a.shape)
    nd = len(shape)
    return pl.BlockSpec(shape, lambda b, _n=nd: (0,) * _n)


def _batch_spec(shape):
    shape = tuple(int(s) for s in shape)
    return pl.BlockSpec((1,) + shape, lambda b: (b, 0, 0))


_PARALLEL = pltpu.CompilerParams(dimension_semantics=("parallel",))


def down_stage_call(x_slab, d, temb, hw, first):
    H, W = hw
    B, Cin, nb = x_slab.shape
    C = d["r1_vec"].shape[0]
    Cn = d["dn_b"].shape[0]
    nb2 = _nb(H // 2, W // 2)
    shifts3 = shifts_anchor(3, 3, W + 2, nb, 1, 1)
    shifts4 = shifts_anchor(4, 4, W + 2, nb, 0, 0)
    mask = jnp.asarray(_mask_np(H, W))
    s_dn = jnp.asarray(_s_down_np(H, W), dtype=jnp.bfloat16)

    args, specs = [], []
    def add(a, s):
        args.append(a); specs.append(s)

    add(x_slab, _batch_spec((Cin, nb)))
    if first:
        add(d["ci_w"], _full_spec(d["ci_w"]))
        add(d["ci_b"], _full_spec(d["ci_b"]))
    add(d["r1_w1"], _full_spec(d["r1_w1"]))
    add(d["r1_w2"], _full_spec(d["r1_w2"]))
    add(d["r1_vec"], _full_spec(d["r1_vec"]))
    add(temb, _batch_spec((C, 1)))
    add(d["r2_w1"], _full_spec(d["r2_w1"]))
    add(d["r2_w2"], _full_spec(d["r2_w2"]))
    add(d["r2_vec"], _full_spec(d["r2_vec"]))
    add(d["dn_w"], _full_spec(d["dn_w"]))
    add(d["dn_b"], _full_spec(d["dn_b"]))
    add(s_dn, _full_spec(s_dn))
    add(mask, _full_spec(mask))

    kernel = functools.partial(
        _down_stage_kernel, first=first, shifts3=shifts3, shifts4=shifts4,
        groups=GROUPS, inv_count=1.0 / ((C // GROUPS) * H * W), eps=GN_EPS)

    res_out, mid_out = pl.pallas_call(
        kernel,
        out_shape=(jax.ShapeDtypeStruct((B, C, nb), jnp.float32),
                   jax.ShapeDtypeStruct((B, Cn, nb2), jnp.float32)),
        grid_spec=pltpu.PrefetchScalarGridSpec(
            num_scalar_prefetch=0, grid=(B,),
            in_specs=specs,
            out_specs=(pl.BlockSpec((1, C, nb), lambda b: (b, 0, 0)),
                       pl.BlockSpec((1, Cn, nb2), lambda b: (b, 0, 0)))),
        compiler_params=_PARALLEL,
    )(*args)
    return res_out, mid_out


def mid_stage_call(x_slab, m, temb, hw):
    H, W = hw
    B, C, nb = x_slab.shape
    shifts3 = shifts_anchor(3, 3, W + 2, nb, 1, 1)
    mask = jnp.asarray(_mask_np(H, W))

    args, specs = [], []
    def add(a, s):
        args.append(a); specs.append(s)

    add(x_slab, _batch_spec((C, nb)))
    for name in ("r1_w1", "r1_w2", "r1_vec", "at_vec", "at_wqkv", "at_bqkv",
                 "at_wo", "at_bo", "r2_w1", "r2_w2", "r2_vec"):
        add(m[name], _full_spec(m[name]))
    add(temb, _batch_spec((2 * C, 1)))
    add(mask, _full_spec(mask))

    kernel = functools.partial(
        _mid_stage_kernel, shifts3=shifts3, groups=GROUPS,
        inv_count=1.0 / ((C // GROUPS) * H * W), eps=GN_EPS,
        scale=float(C) ** (-0.5), C=C)

    return pl.pallas_call(
        kernel,
        out_shape=jax.ShapeDtypeStruct((B, C, nb), jnp.float32),
        grid_spec=pltpu.PrefetchScalarGridSpec(
            num_scalar_prefetch=0, grid=(B,),
            in_specs=specs,
            out_specs=pl.BlockSpec((1, C, nb), lambda b: (b, 0, 0))),
        compiler_params=_PARALLEL,
    )(*args)


def up_stage_call(x_slab, res_slab, u, temb, hw_mid, last):
    Hm, Wm = hw_mid
    B, Cm, nb_mid = x_slab.shape
    _, Cu, nb_out = res_slab.shape
    Ho, Wo = 2 * Hm, 2 * Wm
    shifts_up = shifts_anchor(3, 3, Wm + 2, nb_mid, 0, 0)
    shifts3 = shifts_anchor(3, 3, Wo + 2, nb_out, 1, 1)
    mask = jnp.asarray(_mask_np(Ho, Wo))
    s_up = jnp.asarray(_s_up_np(Hm, Wm), dtype=jnp.bfloat16)

    args, specs = [], []
    def add(a, s):
        args.append(a); specs.append(s)

    add(x_slab, _batch_spec((Cm, nb_mid)))
    add(res_slab, _batch_spec((Cu, nb_out)))
    add(u["up_w"], _full_spec(u["up_w"]))
    add(u["up_b"], _full_spec(u["up_b"]))
    add(s_up, _full_spec(s_up))
    for name in ("r1_w1", "r1_w2", "r1_vec", "r1_sw", "r2_w1", "r2_w2", "r2_vec"):
        add(u[name], _full_spec(u[name]))
    add(temb, _batch_spec((2 * Cu, 1)))
    if last:
        add(u["co_w"], _full_spec(u["co_w"]))
        add(u["co_b"], _full_spec(u["co_b"]))
        e_mat = jnp.asarray(_extract_np(Ho, Wo), dtype=jnp.bfloat16)
        add(e_mat, _full_spec(e_mat))
    add(mask, _full_spec(mask))

    if last:
        out_ch = u["co_b"].shape[0]
        out_shape = jax.ShapeDtypeStruct((B, out_ch, Ho * Wo), jnp.float32)
        out_spec = pl.BlockSpec((1, out_ch, Ho * Wo), lambda b: (b, 0, 0))
    else:
        out_shape = jax.ShapeDtypeStruct((B, Cu, nb_out), jnp.float32)
        out_spec = pl.BlockSpec((1, Cu, nb_out), lambda b: (b, 0, 0))

    kernel = functools.partial(
        _up_stage_kernel, last=last, shifts_up=shifts_up, shifts3=shifts3,
        groups=GROUPS, inv_count=1.0 / ((Cu // GROUPS) * Ho * Wo), eps=GN_EPS,
        c_up=Cu, nb_mid=nb_mid)

    return pl.pallas_call(
        kernel,
        out_shape=out_shape,
        grid_spec=pltpu.PrefetchScalarGridSpec(
            num_scalar_prefetch=0, grid=(B,),
            in_specs=specs,
            out_specs=out_spec),
        compiler_params=_PARALLEL,
    )(*args)


# ---------------------------------------------------------------------------
# Module forward
# ---------------------------------------------------------------------------
def sinusoidal_embedding(time, dim):
    half = dim // 2
    emb = math.log(10000.0) / (half - 1)
    freqs = jnp.exp(jnp.arange(half, dtype=jnp.float32) * -emb)
    args = time[:, None].astype(jnp.float32) * freqs[None, :]
    return jnp.concatenate([jnp.sin(args), jnp.cos(args)], axis=-1)


def time_mlp_fwd(time, p):
    # Tiny (2x32)@(32x32) matmuls -> kept in XLA (MXU tile padding would dominate).
    dim = p["w1"].shape[0]
    e = sinusoidal_embedding(time, dim)
    h = jnp.dot(e, p["w1"]) + p["b1"]
    h = jax.nn.gelu(h, approximate=False)            # nn.GELU default = exact
    return jnp.dot(h, p["w2"]) + p["b2"]


def unet_forward(params, x_nchw, time):
    B, C_in, H, W = x_nchw.shape
    t = time_mlp_fwd(time, params["time_mlp"])

    cpad = params["downs"][0]["ci_w"].shape[1] // 9          # static (from weight shape)
    x = to_slab(x_nchw.astype(jnp.float32), cpad)

    residuals = []
    cur = (H, W)
    for i, d in enumerate(params["downs"]):
        temb = (jnp.dot(t, d["time_w"]) + d["time_b"]).reshape(B, -1, 1)
        res_slab, x = down_stage_call(x, d, temb, cur, first=(i == 0))
        residuals.append(res_slab)
        cur = (cur[0] // 2, cur[1] // 2)

    m = params["mid"]
    temb_m = (jnp.dot(t, m["time_w"]) + m["time_b"]).reshape(B, -1, 1)
    x = mid_stage_call(x, m, temb_m, cur)

    n_ups = len(params["ups"])
    for i, u in enumerate(params["ups"]):
        temb_u = (jnp.dot(t, u["time_w"]) + u["time_b"]).reshape(B, -1, 1)
        res_slab = residuals.pop()
        x = up_stage_call(x, res_slab, u, temb_u, cur, last=(i == n_ups - 1))
        cur = (cur[0] * 2, cur[1] * 2)

    out_ch = params["ups"][-1]["co_b"].shape[0]
    return x.reshape(B, out_ch, cur[0], cur[1])              # NCHW, like PyTorch


# ---------------------------------------------------------------------------
# Deterministic raw params (PyTorch shapes) + one-time Pallas-layout preparation
# ---------------------------------------------------------------------------
def init_params(key, in_channels, time_dim, features):
    keys = jax.random.split(key, 512)
    counter = [0]

    def nk():
        k = keys[counter[0]]
        counter[0] += 1
        return k

    def lin(nin, nout):  # (in, out) layout
        w = jax.random.normal(nk(), (nin, nout), jnp.float32) / math.sqrt(nin)
        b = jax.random.normal(nk(), (nout,), jnp.float32) * 0.01
        return w, b

    def conv(cout, cin, kh, kw):  # PyTorch Conv2d layout
        w = jax.random.normal(nk(), (cout, cin, kh, kw), jnp.float32) / math.sqrt(cin * kh * kw)
        b = jax.random.normal(nk(), (cout,), jnp.float32) * 0.01
        return w, b

    def convT(cin, cout, kh, kw):  # PyTorch ConvTranspose2d layout
        w = jax.random.normal(nk(), (cin, cout, kh, kw), jnp.float32) / math.sqrt(cin * kh * kw)
        b = jax.random.normal(nk(), (cout,), jnp.float32) * 0.01
        return w, b

    def gn(c):
        return jnp.ones((c,), jnp.float32), jnp.zeros((c,), jnp.float32)

    def resp(cin, cout, tdim=None):
        p = {}
        if tdim is not None:
            p["time_w"], p["time_b"] = lin(tdim, cout)
        p["conv1_w"], p["conv1_b"] = conv(cout, cin, 3, 3)
        p["norm1_g"], p["norm1_b"] = gn(cout)
        p["conv2_w"], p["conv2_b"] = conv(cout, cout, 3, 3)
        p["norm2_g"], p["norm2_b"] = gn(cout)
        if cin != cout:
            p["short_w"], p["short_b"] = conv(cout, cin, 1, 1)
        return p

    f = features
    params = {}
    w1, b1 = lin(time_dim, time_dim)
    w2, b2 = lin(time_dim, time_dim)
    params["time_mlp"] = dict(w1=w1, b1=b1, w2=w2, b2=b2)
    params["conv_in_w"], params["conv_in_b"] = conv(f[0], in_channels, 3, 3)

    downs = []
    for i in range(len(f) - 1):
        d = {}
        d["res1"] = resp(f[i], f[i], time_dim)
        d["res2"] = resp(f[i], f[i], None)
        d["down_w"], d["down_b"] = conv(f[i + 1], f[i], 4, 4)
        downs.append(d)
    params["downs"] = downs

    mf = f[-1]
    params["mid_res1"] = resp(mf, mf, time_dim)
    ag, ab = gn(mf)
    qw, qb = lin(mf, mf)
    kw_, kb = lin(mf, mf)
    vw, vb = lin(mf, mf)
    pw, pb = lin(mf, mf)
    params["mid_attn"] = dict(norm_g=ag, norm_b=ab, q_w=qw, q_b=qb, k_w=kw_, k_b=kb,
                              v_w=vw, v_b=vb, proj_w=pw, proj_b=pb)
    params["mid_res2"] = resp(mf, mf, time_dim)

    ups = []
    for i in reversed(range(len(f) - 1)):
        u = {}
        u["up_w"], u["up_b"] = convT(f[i + 1], f[i], 4, 4)
        u["res1"] = resp(f[i] * 2, f[i], time_dim)
        u["res2"] = resp(f[i], f[i], time_dim)
        ups.append(u)
    params["ups"] = ups

    params["conv_out_w"], params["conv_out_b"] = conv(in_channels, f[0], 3, 3)
    return params


def prepare_params(raw, in_channels, time_dim, features):
    """One-time weight re-layout: flattened bf16 conv weights, packed vectors."""
    cpad = max(8, ((in_channels + 7) // 8) * 8)
    f = features

    def res_prep(p, cin, cout):
        out = {"w1": conv_w_flat(p["conv1_w"]),
               "w2": conv_w_flat(p["conv2_w"]),
               "vec": pack_res_vec(p, cout)}
        if "short_w" in p:
            out["sw"] = p["short_w"].reshape(cout, cin).astype(jnp.bfloat16)
        return out

    prep = {"time_mlp": raw["time_mlp"]}

    downs = []
    for i in range(len(f) - 1):
        rd = raw["downs"][i]
        d = {}
        if i == 0:
            d["ci_w"] = conv_w_flat(raw["conv_in_w"], cin_pad=cpad)
            d["ci_b"] = raw["conv_in_b"].reshape(f[0], 1)
        p1 = res_prep(rd["res1"], f[i], f[i])
        p2 = res_prep(rd["res2"], f[i], f[i])
        d["r1_w1"], d["r1_w2"], d["r1_vec"] = p1["w1"], p1["w2"], p1["vec"]
        d["r2_w1"], d["r2_w2"], d["r2_vec"] = p2["w1"], p2["w2"], p2["vec"]
        d["dn_w"] = conv_w_flat(rd["down_w"])
        d["dn_b"] = rd["down_b"].reshape(f[i + 1], 1)
        d["time_w"] = rd["res1"]["time_w"]
        d["time_b"] = rd["res1"]["time_b"]
        downs.append(d)
    prep["downs"] = downs

    mf = f[-1]
    mr1, mr2, at = raw["mid_res1"], raw["mid_res2"], raw["mid_attn"]
    p1 = res_prep(mr1, mf, mf)
    p2 = res_prep(mr2, mf, mf)
    prep["mid"] = {
        "r1_w1": p1["w1"], "r1_w2": p1["w2"], "r1_vec": p1["vec"],
        "r2_w1": p2["w1"], "r2_w2": p2["w2"], "r2_vec": p2["vec"],
        "at_vec": jnp.stack([at["norm_g"], at["norm_b"]], axis=1).astype(jnp.float32),
        "at_wqkv": jnp.concatenate([at["q_w"], at["k_w"], at["v_w"]], axis=1).astype(jnp.bfloat16),
        "at_bqkv": jnp.concatenate([at["q_b"], at["k_b"], at["v_b"]]).reshape(1, 3 * mf),
        "at_wo": at["proj_w"].astype(jnp.bfloat16),
        "at_bo": at["proj_b"].reshape(1, mf),
        "time_w": jnp.concatenate([mr1["time_w"], mr2["time_w"]], axis=1),
        "time_b": jnp.concatenate([mr1["time_b"], mr2["time_b"]]),
    }

    ups = []
    for idx, i in enumerate(reversed(range(len(f) - 1))):
        ru = raw["ups"][idx]
        cu, cm = f[i], f[i + 1]
        u = {"up_w": convT_w_flat(ru["up_w"]),
             "up_b": jnp.tile(ru["up_b"], (4,)).reshape(4 * cu, 1)}
        p1 = res_prep(ru["res1"], 2 * cu, cu)
        p2 = res_prep(ru["res2"], cu, cu)
        u["r1_w1"], u["r1_w2"], u["r1_vec"], u["r1_sw"] = p1["w1"], p1["w2"], p1["vec"], p1["sw"]
        u["r2_w1"], u["r2_w2"], u["r2_vec"] = p2["w1"], p2["w2"], p2["vec"]
        u["time_w"] = jnp.concatenate([ru["res1"]["time_w"], ru["res2"]["time_w"]], axis=1)
        u["time_b"] = jnp.concatenate([ru["res1"]["time_b"], ru["res2"]["time_b"]])
        ups.append(u)
    ups[-1]["co_w"] = conv_w_flat(raw["conv_out_w"])
    ups[-1]["co_b"] = raw["conv_out_b"].reshape(in_channels, 1)
    prep["ups"] = ups
    return prep


# ---------------------------------------------------------------------------
if __name__ == "__main__":
    # UNetConfig(in_channels=4, time_dim=32, features=[16, 32]); GroupNorm(8, C) needs C % 8 == 0.
    in_channels, time_dim, features = 4, 32, [16, 32]
    B, H, W = 2, 16, 16

    _roll_matches_jnp()  # probe hardware rotate direction once (cached)

    key = jax.random.PRNGKey(0)
    kx, kt, kp = jax.random.split(key, 3)
    x = jax.random.normal(kx, (B, in_channels, H, W), jnp.float32)   # NCHW, like PyTorch
    time = jax.random.uniform(kt, (B,), jnp.float32) * 1000.0

    raw_params = init_params(kp, in_channels, time_dim, features)
    params = prepare_params(raw_params, in_channels, time_dim, features)

    fwd = jax.jit(unet_forward)
    out = fwd(params, x, time)
    out = jax.block_until_ready(out)

    assert out.shape == (B, in_channels, H, W), out.shape
    assert bool(jnp.all(jnp.isfinite(out)))
    print("KERNEL_OK")
</pallas_src>

<mosaic_0001>
module attributes {stable_mosaic.version = 11 : i64} {
  func.func @_roll_probe_kernel(%arg0: i32, %arg1: memref<8x128xf32, #tpu.memory_space<vmem>>, %arg2: memref<8x128xf32, #tpu.memory_space<vmem>>) attributes {dimension_semantics = [#tpu.dimension_semantics<arbitrary>], iteration_bounds = array<i64: 1>, scalar_prefetch = 0 : i64, scratch_operands = 0 : i64, tpu.core_type = #tpu.core_type<tc>, window_params = [{pipeline_mode = #tpu.pipeline_mode<synchronous>, transform_indices = @transform_0, window_bounds = array<i64: 8, 128>}, {pipeline_mode = #tpu.pipeline_mode<synchronous>, transform_indices = @transform_1, window_bounds = array<i64: 8, 128>}]} {
    %c0 = arith.constant 0 : index
    %c0_0 = arith.constant 0 : index
    %0 = vector.load %arg1[%c0, %c0_0] : memref<8x128xf32, #tpu.memory_space<vmem>>, vector<8x128xf32>
    %c1_i32 = arith.constant 1 : i32
    %1 = tpu.dynamic_rotate %0 by %c1_i32 dim 1 : vector<8x128xf32>, i32 -> vector<8x128xf32>
    %c0_1 = arith.constant 0 : index
    %c0_2 = arith.constant 0 : index
    %2 = vector.load %arg2[%c0_1, %c0_2] : memref<8x128xf32, #tpu.memory_space<vmem>>, vector<8x128xf32>
    tpu.vector_store %arg2[%c0_1, %c0_2], %1 {strides = array<i32>} : memref<8x128xf32, #tpu.memory_space<vmem>>, vector<8x128xf32>,
    return
  }
  func.func @transform_0(%arg0: i32) -> (i32, i32) {
    %c0_i32 = arith.constant 0 : i32
    %c0_i32_0 = arith.constant 0 : i32
    %c0_i32_1 = arith.constant 0 : i32
    return %c0_i32, %c0_i32_0 : i32, i32
  }
  func.func @transform_1(%arg0: i32) -> (i32, i32) {
    %c0_i32 = arith.constant 0 : i32
    %c0_i32_0 = arith.constant 0 : i32
    %c0_i32_1 = arith.constant 0 : i32
    return %c0_i32, %c0_i32_0 : i32, i32
  }
}

</mosaic_0001>

<bundles_post_ra>
// kernel: tpu_custom_call.1
= control target key start
LH: loop header
LB: loop body
LE: loop exit
PB: predicated region body
PF: predicated region fallthrough
CT: control target
= control target key end

     0   :  { %6 = vsyncpa [#allocation3], 0  ;;  %s118_s0 = inlined_call_operand.hbm [shape: f32[8,128], index: 0, kind: input, shape index: {}]   ;;  %s119_s1 = inlined_call_operand.hbm [shape: f32[8,128], index: 1, kind: output, shape index: {}]  }
   0x1   :  { %7 = vsyncpa [#allocation4], 0  ;;  %s13_s8 = sshll.u32 %s118_s0, 4  ;;  %s99_s9 = smov [#allocation2]   ;;  %s14_s8 = int_to_ptr.hbm [resolvable:$true] %s13_s8 }
   0x2   :  { %s15_s10 = sshll.u32 %s99_s9, 4  ;;  %s16_s10 = int_to_ptr.vmem [resolvable:$true] %s15_s10 }
   0x3   :  { %18 = dma.hbm_to_vmem [thread:$0]  %s14_s8, 128, %s16_s10, [#allocation3]  }
   0x4   :  { %95 = dma.done.wait [#allocation3], 128  }
   0x5   :  { %96 = vsyncadd [#allocation3], 4294967168  ;;  %v23_v0 = vld [vmem:[#allocation2] sm:$0xff]  ;;  %s100_s11 = smov 1   ;;  %s101_s12 = smov [#allocation5]  }
   0x6   :  { %24 = vrot.lane.b32.xlu0 %v23_v0, %s100_s11  ;;  %s32_s13 = sshll.u32 %s101_s12, 4  ;;  %s34_s16 = sshll.u32 %s119_s1, 4  ;;  %s33_s13 = int_to_ptr.vmem [resolvable:$true] %s32_s13  ;;  %s35_s16 = int_to_ptr.hbm [resolvable:$true] %s34_s16 }
  0x78   :  { %v25_v1 = vpop.permute.xlu0 %24 }
  0x79   :  { %26 = vst [vmem:[#allocation5] sm:$0xff] %v25_v1 }
  0x7a   :  { %37 = dma.vmem_to_hbm [thread:$0]  %s33_s13, 128, %s35_s16, [#allocation4]  }
  0x7b   :  { %97 = dma.done.wait [#allocation4], 128  }
  0x7c   :  { %98 = vsyncadd [#allocation4], 4294967168 }
  0x7d   :  { %42 = vsyncpa [#allocation3], 1 }
  0x7e   :  { %43 = vsyncpa [#allocation4], 1 }

</bundles_post_ra>
